<compile_context>
chip_gen: v7x
topology: tpu7x:2x2x1
jax: 0.10.0
libtpu: 0.0.40
codegen_flags: <defaults>
</compile_context>

<pallas_src>
import functools

import jax
import jax.numpy as jnp
from jax.experimental import pallas as pl
from jax.experimental.pallas import tpu as pltpu


def find_multiple(n: int, k: int) -> int:
    if n % k == 0:
        return n
    return n + k - n % k


def _mlp_kernel(x_ref, wfc_ref, wp_ref, o_ref, *, n_hidden):
    # x_ref:   (tm, C)    bf16 input rows
    # wfc_ref: (C, 2H)    [c_fc1.T | (c_mask2-folded c_fc2).T]   bf16
    # wp_ref:  (H, C)     (c_mask1-folded c_proj).T              bf16
    # o_ref:   (tm, C)    f32 output rows
    x = x_ref[...]
    h12 = jnp.dot(x, wfc_ref[...], preferred_element_type=jnp.float32)  # (tm, 2H)
    h1 = h12[:, :n_hidden]
    h2 = h12[:, n_hidden:]
    g = h1 * jax.nn.sigmoid(h1) * h2          # silu(h1) * fc2(x)  (mask2 folded)
    y = jnp.dot(g.astype(wp_ref.dtype), wp_ref[...],
                preferred_element_type=jnp.float32)
    o_ref[...] = y.astype(o_ref.dtype)        # mask1 already folded into wp


@functools.partial(jax.jit, static_argnames=("tm_max",))
def mlp_forward_2d(x2d, wfc_fused_t, wproj_t, *, tm_max=256):
    M, C = x2d.shape
    H = wproj_t.shape[0]
    assert wfc_fused_t.shape == (C, 2 * H)

    # Row tile: as large as tm_max, multiple of 16 (bf16 sublane packing).
    tm = min(tm_max, find_multiple(M, 16))
    m_pad = find_multiple(M, tm)

    xb = x2d.astype(jnp.bfloat16)
    if m_pad != M:
        xb = jnp.pad(xb, ((0, m_pad - M), (0, 0)))

    # Advisory cost for XLA's scheduler.
    flops = 2 * m_pad * C * (2 * H) + 2 * m_pad * H * C
    bytes_accessed = (m_pad * C * 2            # x   (bf16)
                      + (C * 2 * H + H * C) * 2  # weights (bf16)
                      + m_pad * C * 4)         # out (f32)
    cost = pl.CostEstimate(flops=flops,
                           transcendentals=m_pad * H,
                           bytes_accessed=bytes_accessed)

    # VMEM budget: double-buffered resident weights + x/out tiles + headroom
    # for f32 intermediates; clamp to [32 MiB, 64 MiB] (safe on v5e..v7x).
    vmem_need = (2 * (C * 2 * H + H * C) * 2        # weights, 2 pipeline bufs
                 + 2 * tm * C * (2 + 4)             # x + out tiles, 2 bufs
                 + 4 * tm * 2 * H * 4)              # intermediate headroom
    vmem_limit = int(min(max(2 * vmem_need, 32 * 1024 * 1024),
                         64 * 1024 * 1024))

    y = pl.pallas_call(
        functools.partial(_mlp_kernel, n_hidden=H),
        out_shape=jax.ShapeDtypeStruct((m_pad, C), jnp.float32),
        grid_spec=pltpu.PrefetchScalarGridSpec(
            num_scalar_prefetch=0,
            grid=(m_pad // tm,),
            in_specs=[
                pl.BlockSpec((tm, C), lambda i: (i, 0)),
                pl.BlockSpec((C, 2 * H), lambda i: (0, 0)),
                pl.BlockSpec((H, C), lambda i: (0, 0)),
            ],
            out_specs=pl.BlockSpec((tm, C), lambda i: (i, 0)),
        ),
        compiler_params=pltpu.CompilerParams(
            dimension_semantics=("parallel",),
            vmem_limit_bytes=vmem_limit),
        cost_estimate=cost,
    )(xb, wfc_fused_t, wproj_t)

    return y[:M] if m_pad != M else y


def make_mlp_params(key, n_embd, num_new_dim=None, dtype=jnp.float32):
    """Deterministic parameter construction mirroring MLP.__init__, plus
    one-time kernel weight prep (mask folding, fusion, bf16 cast)."""
    hidden_dim = 4 * n_embd
    n_hidden = find_multiple(int(2 * hidden_dim / 3), 256)

    if num_new_dim is not None:
        old_n_hidden = find_multiple(int((n_embd - num_new_dim) * 8 / 3), 256)
        c_mask1 = jnp.ones((n_embd,), dtype).at[-num_new_dim:].set(0.0)
        if n_hidden > old_n_hidden:
            c_mask2 = jnp.ones((n_hidden,), dtype)
            c_mask2 = c_mask2.at[-(n_hidden - old_n_hidden):].set(0.0)
        else:
            c_mask2 = jnp.ones((n_hidden,), dtype)
    else:
        c_mask1 = jnp.ones((n_embd,), dtype)
        c_mask2 = jnp.ones((n_hidden,), dtype)

    k1, k2, k3 = jax.random.split(key, 3)
    # nn.Linear(in, out, bias=False): weight (out, in), U(-1/sqrt(in), 1/sqrt(in))
    b1 = 1.0 / (n_embd ** 0.5)
    bp = 1.0 / (n_hidden ** 0.5)
    w_fc1 = jax.random.uniform(k1, (n_hidden, n_embd), dtype, -b1, b1)
    w_fc2 = jax.random.uniform(k2, (n_hidden, n_embd), dtype, -b1, b1)
    w_proj = jax.random.uniform(k3, (n_embd, n_hidden), dtype, -bp, bp)

    # One-time kernel weight prep:
    #   m2*silu(x@W1.T)*(x@W2.T)  ==  silu(x@W1.T) * (x@(diag(m2)@W2).T)
    #   m1*(h@Wp.T)               ==  h@(diag(m1)@Wp).T
    w_fc2_m = w_fc2 * c_mask2[:, None]        # scale rows of (H, C)
    w_proj_m = w_proj * c_mask1[:, None]      # scale rows of (C, H)
    wfc_fused_t = jnp.concatenate([w_fc1.T, w_fc2_m.T], axis=1).astype(jnp.bfloat16)  # (C, 2H)
    wproj_t = w_proj_m.T.astype(jnp.bfloat16)                                          # (H, C)

    return dict(w_fc1=w_fc1, w_fc2=w_fc2, w_proj=w_proj,
                c_mask1=c_mask1, c_mask2=c_mask2,
                wfc_fused_t=wfc_fused_t, wproj_t=wproj_t,
                n_embd=n_embd, n_hidden=n_hidden)


def mlp_apply(params, x, tm_max=256):
    """x: (B, T, n_embd) -> (1, B, T, n_embd) (torch broadcast with (1,1,1,C))."""
    B, T, C = x.shape
    x2d = x.reshape(B * T, C)
    y2d = mlp_forward_2d(x2d, params["wfc_fused_t"], params["wproj_t"],
                         tm_max=tm_max)
    return y2d.reshape(1, B, T, C)


def mlp_reference(params, x):
    """Pure-JAX f32 reference mirroring the torch forward exactly."""
    C = params["n_embd"]
    H = params["n_hidden"]
    m1 = params["c_mask1"].reshape(1, 1, 1, C)
    m2 = params["c_mask2"].reshape(1, 1, 1, H)
    h = m2 * jax.nn.silu(x @ params["w_fc1"].T) * (x @ params["w_fc2"].T)
    return m1 * (h @ params["w_proj"].T)


if __name__ == "__main__":
    key = jax.random.PRNGKey(0)
    kp, kx = jax.random.split(key)

    n_embd = 128          # -> n_hidden = 512
    num_new_dim = 32      # exercises both channel masks
    B, T = 2, 8

    params = make_mlp_params(kp, n_embd, num_new_dim)
    x = jax.random.normal(kx, (B, T, n_embd), jnp.float32)

    y = mlp_apply(params, x)
    y = jax.block_until_ready(y)

    y_ref = mlp_reference(params, x)
    assert y.shape == (1, B, T, n_embd), y.shape
    # Masked output channels are exactly zero (mask folding is exact).
    assert bool(jnp.all(y[..., -num_new_dim:] == 0.0))
    # bf16 operands / f32 accumulation vs full-f32 reference.
    assert jnp.allclose(y, y_ref, atol=3e-2, rtol=3e-2), \
        float(jnp.max(jnp.abs(y - y_ref)))

    print("KERNEL_OK")
</pallas_src>

<mosaic_0001>
module attributes {stable_mosaic.version = 11 : i64} {
  func.func @_mlp_kernel(%arg0: i32, %arg1: memref<16x128xbf16, #tpu.memory_space<vmem>>, %arg2: memref<128x1024xbf16, #tpu.memory_space<vmem>>, %arg3: memref<512x128xbf16, #tpu.memory_space<vmem>>, %arg4: memref<16x128xf32, #tpu.memory_space<vmem>>) attributes {dimension_semantics = [#tpu.dimension_semantics<parallel>], iteration_bounds = array<i64: 1>, scalar_prefetch = 0 : i64, scratch_operands = 0 : i64, tpu.core_type = #tpu.core_type<tc>, window_params = [{transform_indices = @transform_0, window_bounds = array<i64: 16, 128>}, {pipeline_mode = #tpu.pipeline_mode<synchronous>, transform_indices = @transform_1, window_bounds = array<i64: 128, 1024>}, {pipeline_mode = #tpu.pipeline_mode<synchronous>, transform_indices = @transform_2, window_bounds = array<i64: 512, 128>}, {transform_indices = @transform_3, window_bounds = array<i64: 16, 128>}]} {
    %c0 = arith.constant 0 : index
    %c0_0 = arith.constant 0 : index
    %0 = vector.load %arg1[%c0, %c0_0] : memref<16x128xbf16, #tpu.memory_space<vmem>>, vector<16x128xbf16>
    %c0_1 = arith.constant 0 : index
    %c0_2 = arith.constant 0 : index
    %1 = vector.load %arg2[%c0_1, %c0_2] : memref<128x1024xbf16, #tpu.memory_space<vmem>>, vector<128x1024xbf16>
    %cst = arith.constant dense<0.000000e+00> : vector<16x1024xf32>
    %2 = tpu.matmul %0, %1, %cst {dimension_numbers = #tpu.dot_dimension_numbers<[1], [0], [0], [1], [0, 0, 1, 1], [], []>} : vector<16x128xbf16>, vector<128x1024xbf16>, vector<16x1024xf32> -> vector<16x1024xf32>
    %3 = vector.extract_strided_slice %2 {offsets = [0, 0], sizes = [16, 512], strides = [1, 1]} : vector<16x1024xf32> to vector<16x512xf32>
    %4 = vector.extract_strided_slice %2 {offsets = [0, 512], sizes = [16, 512], strides = [1, 1]} : vector<16x1024xf32> to vector<16x512xf32>
    %5 = arith.negf %3 : vector<16x512xf32>
    %6 = math.exp %5 : vector<16x512xf32>
    %cst_3 = arith.constant 1.000000e+00 : f32
    %7 = vector.broadcast %cst_3 : f32 to vector<16x512xf32>
    %8 = arith.addf %7, %6 : vector<16x512xf32>
    %9 = arith.divf %7, %8 : vector<16x512xf32>
    %10 = arith.mulf %3, %9 : vector<16x512xf32>
    %11 = arith.mulf %10, %4 : vector<16x512xf32>
    %12 = arith.truncf %11 : vector<16x512xf32> to vector<16x512xbf16>
    %c0_4 = arith.constant 0 : index
    %c0_5 = arith.constant 0 : index
    %13 = vector.load %arg3[%c0_4, %c0_5] : memref<512x128xbf16, #tpu.memory_space<vmem>>, vector<512x128xbf16>
    %cst_6 = arith.constant dense<0.000000e+00> : vector<16x128xf32>
    %14 = tpu.matmul %12, %13, %cst_6 {dimension_numbers = #tpu.dot_dimension_numbers<[1], [0], [0], [1], [0, 0, 1, 1], [], []>} : vector<16x512xbf16>, vector<512x128xbf16>, vector<16x128xf32> -> vector<16x128xf32>
    %c0_7 = arith.constant 0 : index
    %c0_8 = arith.constant 0 : index
    %15 = vector.load %arg4[%c0_7, %c0_8] : memref<16x128xf32, #tpu.memory_space<vmem>>, vector<16x128xf32>
    tpu.vector_store %arg4[%c0_7, %c0_8], %14 {strides = array<i32>} : memref<16x128xf32, #tpu.memory_space<vmem>>, vector<16x128xf32>,
    return
  }
  func.func @transform_0(%arg0: i32) -> (i32, i32) {
    %c0_i32 = arith.constant 0 : i32
    %c0_i32_0 = arith.constant 0 : i32
    return %arg0, %c0_i32 : i32, i32
  }
  func.func @transform_1(%arg0: i32) -> (i32, i32) {
    %c0_i32 = arith.constant 0 : i32
    %c0_i32_0 = arith.constant 0 : i32
    %c0_i32_1 = arith.constant 0 : i32
    return %c0_i32, %c0_i32_0 : i32, i32
  }
  func.func @transform_2(%arg0: i32) -> (i32, i32) {
    %c0_i32 = arith.constant 0 : i32
    %c0_i32_0 = arith.constant 0 : i32
    %c0_i32_1 = arith.constant 0 : i32
    return %c0_i32, %c0_i32_0 : i32, i32
  }
  func.func @transform_3(%arg0: i32) -> (i32, i32) {
    %c0_i32 = arith.constant 0 : i32
    %c0_i32_0 = arith.constant 0 : i32
    return %arg0, %c0_i32 : i32, i32
  }
}

</mosaic_0001>

<bundles_post_ra>
// kernel: mlp_forward_2d.1
= control target key start
LH: loop header
LB: loop body
LE: loop exit
PB: predicated region body
PF: predicated region fallthrough
CT: control target
= control target key end

     0   :  { %8 = vsyncpa [#allocation3], 0  ;;  %s1409_s0 = inlined_call_operand.vmem [shape: bf16[16,128], index: 0, kind: input, shape index: {}]   ;;  %s1410_s1 = inlined_call_operand.hbm [shape: bf16[128,1024], index: 1, kind: input, shape index: {}]   ;;  %s1411_s2 = inlined_call_operand.hbm [shape: bf16[512,128], index: 2, kind: input, shape index: {}]   ;;  %s1412_s3 = inlined_call_operand.hbm [shape: f32[16,128], index: 3, kind: output, shape index: {}]  }
   0x1   :  { %9 = vsyncpa [#allocation6], 0 }
   0x2   :  { %10 = vsyncpa [#allocation4], 0  ;;  %s1330_s12 = smov [#allocation2]   ;;  %s1258_s16 = scalar_lea.hbm %s1410_s1, 8192 }
   0x3   :  { %s18_s13 = sshll.u32 %s1330_s12, 4  ;;  %p1259_p0 = scmp.ne.s32.totalorder %s1410_s1, %s1258_s16  ;;  %s19_s13 = int_to_ptr.vmem [resolvable:$true] %s18_s13 }
   0x4   :  { %p1262_p1 = scmp.lt.u32.totalorder %s1258_s16, %s1410_s1 }
   0x6   :  { %p1264_p2 = pnand %p1262_p1, %p1259_p0 }
   0x8   :  { %1267 = shalt.err (!%p1264_p2)
}
   0x9   :  { %s1268_s21 = scalar_lea.vmem %s19_s13, 8192  ;;  %p1273_p4 = scmp.lt.s32.totalorder %s19_s13, %s19_s13 }
   0xa   :  { %p1269_p3 = scmp.ne.s32.totalorder %s19_s13, %s1268_s21  ;;  %p1274_p5 = scmp.lt.s32.totalorder %s1268_s21, %s1268_s21 }
   0xc   :  { %p1275_p6 = por %p1274_p5, %p1273_p4 }
   0xe   :  { %p1276_p7 = pnand %p1275_p6, %p1269_p3 }
  0x10   :  { %1279 = shalt.err (!%p1276_p7)
}
  0x11   :  { %s1331_s22 = smov 512   ;;  %s1332_s23 = smov 32  }
  0x12   :  { %24 = dma.hbm_to_vmem [thread:$0]  %s1410_s1, 8192, %s19_s13, [#allocation3], %s1331_s22, %s1331_s22, %s1332_s23  }
  0x13   :  { %s1333_s26 = smov [#allocation5]   ;;  %s1280_s30 = scalar_lea.hbm %s1411_s2, 4096 }
  0x14   :  { %s30_s27 = sshll.u32 %s1333_s26, 4  ;;  %p1281_p8 = scmp.ne.s32.totalorder %s1411_s2, %s1280_s30  ;;  %s31_s27 = int_to_ptr.vmem [resolvable:$true] %s30_s27 }
  0x15   :  { %p1284_p9 = scmp.lt.u32.totalorder %s1280_s30, %s1411_s2 }
  0x17   :  { %p1286_p10 = pnand %p1284_p9, %p1281_p8 }
  0x19   :  { %1289 = shalt.err (!%p1286_p10)
}
  0x1a   :  { %s1290_s8 = scalar_lea.vmem %s31_s27, 4096  ;;  %p1295_p12 = scmp.lt.s32.totalorder %s31_s27, %s31_s27 }
  0x1b   :  { %p1291_p11 = scmp.ne.s32.totalorder %s31_s27, %s1290_s8  ;;  %p1296_p13 = scmp.lt.s32.totalorder %s1290_s8, %s1290_s8 }
  0x1d   :  { %p1297_p0 = por %p1296_p13, %p1295_p12 }
  0x1f   :  { %p1298_p1 = pnand %p1297_p0, %p1291_p11 }
  0x21   :  { %1301 = shalt.err (!%p1298_p1)
}
  0x22   :  { %s1334_s1 = smov 64   ;;  %s1335_s9 = smov 4  }
  0x23   :  { %36 = dma.hbm_to_vmem [thread:$0]  %s1411_s2, 4096, %s31_s27, [#allocation6], %s1334_s1, %s1334_s1, %s1335_s9  }
  0x24   :  { %1324 = dma.done.wait [#allocation3], 8192  }
  0x25   :  { %1325 = vsyncadd [#allocation3], 4294959104 }
  0x26   :  { %1326 = dma.done.wait [#allocation6], 4096  }
  0x27   :  { %1327 = vsyncadd [#allocation6], 4294963200  ;;  %v1336_v0 = vmov 0   ;;  %v46_v1 = vld [vmem:[#allocation2] sm:$0xff]  ;;  %v47_v3 = vld [vmem:[#allocation2 + $0x8] sm:$0xff] }
  0x28   :  { %468 = vmatprep.mubr.bf16.mxu0 %v1336_v0  ;;  %511 = vmatprep.mubr.bf16.mxu1 %v1336_v0  ;;  %v50_v2 = vld [vmem:[#allocation2 + $0x20] sm:$0xff]  ;;  %v51_v5 = vld [vmem:[#allocation2 + $0x28] sm:$0xff]  ;;  %v48_v60 = vld [vmem:[#allocation2 + $0x10] sm:$0xff] }
  0x29   :  { %v1036_v4 = vcombine.high %v46_v1, %v50_v2  ;;  %v1035_v6 = vcombine.low %v46_v1, %v50_v2  ;;  %v54_v7 = vld [vmem:[#allocation2 + $0x40] sm:$0xff]  ;;  %v1038_v9 = vcombine.high %v47_v3, %v51_v5  ;;  %v1037_v10 = vcombine.low %v47_v3, %v51_v5  ;;  %v55_v12 = vld [vmem:[#allocation2 + $0x48] sm:$0xff]  ;;  %v52_v61 = vld [vmem:[#allocation2 + $0x30] sm:$0xff] }
  0x2a   :  { %v58_v8 = vld [vmem:[#allocation2 + $0x60] sm:$0xff]  ;;  %v59_v13 = vld [vmem:[#allocation2 + $0x68] sm:$0xff]  ;;  %v49_v1 = vld [vmem:[#allocation2 + $0x18] sm:$0xff] }
  0x2b   :  { %v1044_v11 = vcombine.high %v54_v7, %v58_v8  ;;  %v62_v14 = vld [vmem:[#allocation2 + $0x80] sm:$0xff]  ;;  %436 = vmatprep.subr.bf16.mxu0 %v1036_v4  ;;  %v1046_v15 = vcombine.high %v55_v12, %v59_v13  ;;  %v63_v17 = vld [vmem:[#allocation2 + $0x88] sm:$0xff]  ;;  %479 = vmatprep.subr.bf16.mxu1 %v1038_v9  ;;  %v1043_v19 = vcombine.low %v54_v7, %v58_v8  ;;  %v53_v2 = vld [vmem:[#allocation2 + $0x38] sm:$0xff] }
  0x2c   :  { %v66_v16 = vld [vmem:[#allocation2 + $0xa0] sm:$0xff]  ;;  %v67_v18 = vld [vmem:[#allocation2 + $0xa8] sm:$0xff]  ;;  %437 = vmatpush1.bf16.msra.mxu0 %v1035_v6  ;;  %480 = vmatpush1.bf16.msra.mxu1 %v1037_v10  ;;  %v1045_v20 = vcombine.low %v55_v12, %v59_v13  ;;  %v56_v5 = vld [vmem:[#allocation2 + $0x50] sm:$0xff]  ;;  %v1040_v9 = vcombine.high %v48_v60, %v52_v61  ;;  %v1042_v12 = vcombine.high %v49_v1, %v53_v2 }
  0x2d   :  { %438 = vmatprep.subr.bf16.mxu0 %v1044_v11  ;;  %v1052_v21 = vcombine.high %v62_v14, %v66_v16  ;;  %481 = vmatprep.subr.bf16.mxu1 %v1046_v15  ;;  %v1054_v22 = vcombine.high %v63_v17, %v67_v18  ;;  %v70_v23 = vld [vmem:[#allocation2 + $0xc0] sm:$0xff]  ;;  %v71_v25 = vld [vmem:[#allocation2 + $0xc8] sm:$0xff]  ;;  %v1051_v27 = vcombine.low %v62_v14, %v66_v16  ;;  %v60_v6 = vld [vmem:[#allocation2 + $0x70] sm:$0xff] }
  0x2e   :  { %v74_v24 = vld [vmem:[#allocation2 + $0xe0] sm:$0xff]  ;;  %v75_v26 = vld [vmem:[#allocation2 + $0xe8] sm:$0xff]  ;;  %v1053_v28 = vcombine.low %v63_v17, %v67_v18  ;;  %v1389_v8 = vld [vmem:[%s1409_s0] sm:$0xff]   ;;  %v1039_v13 = vcombine.low %v48_v60, %v52_v61  ;;  %v1041_v16 = vcombine.low %v49_v1, %v53_v2  ;;  %v1048_v17 = vcombine.high %v56_v5, %v60_v6  ;;  %s1337_s0 = smov [#allocation7]  }
  0x2f   :  { %v1060_v29 = vcombine.high %v70_v23, %v74_v24  ;;  %v1062_v30 = vcombine.high %v71_v25, %v75_v26  ;;  %v78_v31 = vld [vmem:[#allocation2 + $0x100] sm:$0xff]  ;;  %v79_v33 = vld [vmem:[#allocation2 + $0x108] sm:$0xff]  ;;  %v1059_v35 = vcombine.low %v70_v23, %v74_v24  ;;  %v1061_v36 = vcombine.low %v71_v25, %v75_v26  ;;  %v57_v10 = vld [vmem:[#allocation2 + $0x58] sm:$0xff]  ;;  %s1021_s13 = sshll.u32 %s1337_s0, 4  ;;  %s1022_s13 = int_to_ptr.vmem [resolvable:$true] %s1021_s13 }
  0x30   :  { %439 = vmatpush1.bf16.msra.mxu0 %v1043_v19  ;;  %482 = vmatpush1.bf16.msra.mxu1 %v1045_v20  ;;  %v82_v32 = vld [vmem:[#allocation2 + $0x120] sm:$0xff]  ;;  %v83_v34 = vld [vmem:[#allocation2 + $0x128] sm:$0xff]  ;;  %v61_v11 = vld [vmem:[#allocation2 + $0x78] sm:$0xff]  ;;  %s1302_s14 = scalar_lea.vmem %s1022_s13, 256  ;;  %p1307_p3 = scmp.lt.s32.totalorder %s1022_s13, %s1022_s13 }
  0x31   :  { %440 = vmatprep.subr.bf16.mxu0 %v1052_v21  ;;  %483 = vmatprep.subr.bf16.mxu1 %v1054_v22  ;;  %v1068_v37 = vcombine.high %v78_v31, %v82_v32  ;;  %v1070_v38 = vcombine.high %v79_v33, %v83_v34  ;;  %v86_v39 = vld [vmem:[#allocation2 + $0x140] sm:$0xff]  ;;  %v87_v41 = vld [vmem:[#allocation2 + $0x148] sm:$0xff]  ;;  %v1067_v43 = vcombine.low %v78_v31, %v82_v32  ;;  %v64_v14 = vld [vmem:[#allocation2 + $0x90] sm:$0xff]  ;;  %p1303_p2 = scmp.ne.s32.totalorder %s1022_s13, %s1302_s14  ;;  %p1308_p4 = scmp.lt.s32.totalorder %s1302_s14, %s1302_s14 }
  0x32   :  { %v90_v40 = vld [vmem:[#allocation2 + $0x160] sm:$0xff]  ;;  %v91_v42 = vld [vmem:[#allocation2 + $0x168] sm:$0xff]  ;;  %v1069_v44 = vcombine.low %v79_v33, %v83_v34  ;;  %v68_v15 = vld [vmem:[#allocation2 + $0xb0] sm:$0xff]  ;;  %v1050_v20 = vcombine.high %v57_v10, %v61_v11  ;;  %v1047_v21 = vcombine.low %v56_v5, %v60_v6  ;;  %v1049_v24 = vcombine.low %v57_v10, %v61_v11 }
  0x33   :  { %v1076_v45 = vcombine.high %v86_v39, %v90_v40  ;;  %v1078_v46 = vcombine.high %v87_v41, %v91_v42  ;;  %v94_v47 = vld [vmem:[#allocation2 + $0x180] sm:$0xff]  ;;  %v95_v49 = vld [vmem:[#allocation2 + $0x188] sm:$0xff]  ;;  %v1075_v51 = vcombine.low %v86_v39, %v90_v40  ;;  %v1077_v52 = vcombine.low %v87_v41, %v91_v42  ;;  %v65_v18 = vld [vmem:[#allocation2 + $0x98] sm:$0xff]  ;;  %p1309_p5 = por %p1308_p4, %p1307_p3 }
  0x34   :  { %441 = vmatpush1.bf16.msra.mxu0 %v1051_v27  ;;  %484 = vmatpush1.bf16.msra.mxu1 %v1053_v28  ;;  %v98_v48 = vld [vmem:[#allocation2 + $0x1a0] sm:$0xff]  ;;  %v99_v50 = vld [vmem:[#allocation2 + $0x1a8] sm:$0xff]  ;;  %v69_v19 = vld [vmem:[#allocation2 + $0xb8] sm:$0xff]  ;;  %v1056_v25 = vcombine.high %v64_v14, %v68_v15 }
  0x35   :  { %442 = vmatprep.subr.bf16.mxu0 %v1060_v29  ;;  %485 = vmatprep.subr.bf16.mxu1 %v1062_v30  ;;  %v1084_v53 = vcombine.high %v94_v47, %v98_v48  ;;  %v102_v54 = vld [vmem:[#allocation2 + $0x1c0] sm:$0xff]  ;;  %v103_v56 = vld [vmem:[#allocation2 + $0x1c8] sm:$0xff]  ;;  %v1086_v57 = vcombine.high %v95_v49, %v99_v50  ;;  %v1083_v59 = vcombine.low %v94_v47, %v98_v48  ;;  %v72_v22 = vld [vmem:[#allocation2 + $0xd0] sm:$0xff]  ;;  %p1310_p6 = pnand %p1309_p5, %p1303_p2 }
  0x36   :  { %v106_v55 = vld [vmem:[#allocation2 + $0x1e0] sm:$0xff]  ;;  %v107_v58 = vld [vmem:[#allocation2 + $0x1e8] sm:$0xff]  ;;  %v1085_v62 = vcombine.low %v95_v49, %v99_v50  ;;  %v76_v23 = vld [vmem:[#allocation2 + $0xf0] sm:$0xff]  ;;  %v1058_v28 = vcombine.high %v65_v18, %v69_v19  ;;  %v1055_v29 = vcombine.low %v64_v14, %v68_v15  ;;  %v1057_v32 = vcombine.low %v65_v18, %v69_v19 }
  0x37   :  { %v1092_v63 = vcombine.high %v102_v54, %v106_v55  ;;  %v1094_v3 = vcombine.high %v103_v56, %v107_v58  ;;  %v1091_v4 = vcombine.low %v102_v54, %v106_v55  ;;  %v1093_v7 = vcombine.low %v103_v56, %v107_v58  ;;  %v73_v26 = vld [vmem:[#allocation2 + $0xd8] sm:$0xff]  ;;  %v80_v30 = vld [vmem:[#allocation2 + $0x110] sm:$0xff]  ;;  %v1196_v5 = vld [vmem:[#allocation5] sm:$0xff]  }
  0x38   :  { %443 = vmatpush1.bf16.msra.mxu0 %v1059_v35  ;;  %486 = vmatpush1.bf16.msra.mxu1 %v1061_v36  ;;  %v77_v27 = vld [vmem:[#allocation2 + $0xf8] sm:$0xff]  ;;  %v84_v31 = vld [vmem:[#allocation2 + $0x130] sm:$0xff]  ;;  %v1064_v33 = vcombine.high %v72_v22, %v76_v23  ;;  %v1197_v6 = vld [vmem:[#allocation5 + $0x80] sm:$0xff]  }
  0x39   :  { %444 = vmatprep.subr.bf16.mxu0 %v1068_v37  ;;  %487 = vmatprep.subr.bf16.mxu1 %v1070_v38  ;;  %v81_v34 = vld [vmem:[#allocation2 + $0x118] sm:$0xff]  ;;  %v1066_v35 = vcombine.high %v73_v26, %v77_v27  ;;  %v1063_v37 = vcombine.low %v72_v22, %v76_v23  ;;  %v1065_v38 = vcombine.low %v73_v26, %v77_v27  ;;  %v88_v40 = vld [vmem:[#allocation2 + $0x150] sm:$0xff]  ;;  %v1200_v10 = vld [vmem:[#allocation5 + $0x8] sm:$0xff]  }
  0x3a   :  { %v85_v36 = vld [vmem:[#allocation2 + $0x138] sm:$0xff]  ;;  %v1072_v39 = vcombine.high %v80_v30, %v84_v31  ;;  %v92_v41 = vld [vmem:[#allocation2 + $0x170] sm:$0xff]  ;;  %v1201_v11 = vld [vmem:[#allocation5 + $0x88] sm:$0xff]  }
  0x3b   :  { %v89_v42 = vld [vmem:[#allocation2 + $0x158] sm:$0xff]  ;;  %v96_v48 = vld [vmem:[#allocation2 + $0x190] sm:$0xff]  ;;  %v1210_v19 = vld [vmem:[#allocation5 + $0x60] sm:$0xff]  }
  0x3c   :  { %445 = vmatpush1.bf16.msra.mxu0 %v1067_v43  ;;  %488 = vmatpush1.bf16.msra.mxu1 %v1069_v44  ;;  %v93_v43 = vld [vmem:[#allocation2 + $0x178] sm:$0xff]  ;;  %v1071_v44 = vcombine.low %v80_v30, %v84_v31  ;;  %v100_v49 = vld [vmem:[#allocation2 + $0x1b0] sm:$0xff]  ;;  %v1213_v22 = vld [vmem:[#allocation5 + $0xa0] sm:$0xff]  }
  0x3d   :  { %446 = vmatprep.subr.bf16.mxu0 %v1076_v45  ;;  %489 = vmatprep.subr.bf16.mxu1 %v1078_v46  ;;  %v1073_v45 = vcombine.low %v81_v34, %v85_v36  ;;  %v1080_v46 = vcombine.high %v88_v40, %v92_v41  ;;  %v1082_v47 = vcombine.high %v89_v42, %v93_v43  ;;  %v97_v50 = vld [vmem:[#allocation2 + $0x198] sm:$0xff]  ;;  %v104_v56 = vld [vmem:[#allocation2 + $0x1d0] sm:$0xff]  ;;  %v1214_v23 = vld [vmem:[#allocation5 + $0x68] sm:$0xff]  }
  0x3e   :  { %v1088_v54 = vcombine.high %v96_v48, %v100_v49  ;;  %v105_v58 = vld [vmem:[#allocation2 + $0x1d8] sm:$0xff]  ;;  %v1087_v60 = vcombine.low %v96_v48, %v100_v49  ;;  %v1204_v14 = vld [vmem:[#allocation5 + $0x10] sm:$0xff]   ;;  %v1217_v26 = vld [vmem:[#allocation5 + $0xa8] sm:$0xff]  }
  0x3f   :  { %v1206_v15 = vld [vmem:[#allocation5 + $0x58] sm:$0xff]   ;;  %v1218_v27 = vld [vmem:[#allocation5 + $0x70] sm:$0xff]  }
  0x40   :  { %447 = vmatpush1.bf16.msra.mxu0 %v1075_v51  ;;  %490 = vmatpush1.bf16.msra.mxu1 %v1077_v52  ;;  %v101_v51 = vld [vmem:[#allocation2 + $0x1b8] sm:$0xff]  ;;  %v1079_v52 = vcombine.low %v88_v40, %v92_v41  ;;  %v1221_v30 = vld [vmem:[#allocation5 + $0xb0] sm:$0xff]  }
  0x41   :  { %448 = vmatprep.subr.bf16.mxu0 %v1084_v53  ;;  %491 = vmatprep.subr.bf16.mxu1 %v1086_v57  ;;  %v1081_v53 = vcombine.low %v89_v42, %v93_v43  ;;  %v1090_v55 = vcombine.high %v97_v50, %v101_v51  ;;  %v108_v57 = vld [vmem:[#allocation2 + $0x1f0] sm:$0xff]  ;;  %v1089_v61 = vcombine.low %v97_v50, %v101_v51  ;;  %v1209_v18 = vld [vmem:[#allocation5 + $0x98] sm:$0xff]  }
  0x42   :  { %v1095_v1 = vcombine.low %v104_v56, %v108_v57  ;;  %v1222_v31 = vld [vmem:[#allocation5 + $0x78] sm:$0xff]  }
  0x44   :  { %449 = vmatpush1.bf16.msra.mxu0 %v1083_v59  ;;  %492 = vmatpush1.bf16.msra.mxu1 %v1085_v62  ;;  %v109_v59 = vld [vmem:[#allocation2 + $0x1f8] sm:$0xff]  ;;  %v1096_v62 = vcombine.high %v104_v56, %v108_v57 }
  0x45   :  { %450 = vmatprep.subr.bf16.mxu0 %v1092_v63  ;;  %493 = vmatprep.subr.bf16.mxu1 %v1094_v3  ;;  %v1098_v63 = vcombine.high %v105_v58, %v109_v59  ;;  %v1097_v2 = vcombine.low %v105_v58, %v109_v59  ;;  %v1194_v3 = vld [vmem:[#allocation5 + $0x40] sm:$0xff]  }
  0x48   :  { %451 = vmatpush1.bf16.msra.mxu0 %v1091_v4  ;;  %494 = vmatpush1.bf16.msra.mxu1 %v1093_v7  ;;  %v1195_v4 = vld [vmem:[#allocation5 + $0xc0] sm:$0xff]   ;;  %v1198_v7 = vld [vmem:[#allocation5 + $0x48] sm:$0xff]  }
  0x49   :  { %522 = vmatprep.subr.bf16.mxu0 %v1040_v9  ;;  %565 = vmatprep.subr.bf16.mxu1 %v1042_v12  ;;  %v1199_v9 = vld [vmem:[#allocation5 + $0xc8] sm:$0xff]   ;;  %v1202_v12 = vld [vmem:[#allocation5 + $0x50] sm:$0xff]  }
  0x4b   :  { %469 = vmatmul.mubr.bf16.vlgmr.msra.gmra.mrb[0].mxu0 %v1389_v8  ;;  %512 = vmatmul.mubr.bf16.vlgmr.msra.gmra.mrb[0].mxu1 %v1389_v8 }
  0x4c   :  { %523 = vmatpush1.bf16.msra.mxu0 %v1039_v13  ;;  %566 = vmatpush1.bf16.msra.mxu1 %v1041_v16  ;;  %v1203_v13 = vld [vmem:[#allocation5 + $0xd0] sm:$0xff]   ;;  %v1207_v16 = vld [vmem:[#allocation5 + $0xd8] sm:$0xff]  }
  0x4d   :  { %524 = vmatprep.subr.bf16.mxu0 %v1048_v17  ;;  %567 = vmatprep.subr.bf16.mxu1 %v1050_v20  ;;  %v1208_v17 = vld [vmem:[#allocation5 + $0x18] sm:$0xff]   ;;  %v1211_v20 = vld [vmem:[#allocation5 + $0xe0] sm:$0xff]  }
  0x4e   :  { %554 = vmatprep.mubr.bf16.mxu0 %v1336_v0  ;;  %597 = vmatprep.mubr.bf16.mxu1 %v1336_v0  ;;  %v1074_v0 = vcombine.high %v81_v34, %v85_v36  ;;  %v1225_v34 = vld [vmem:[#allocation5 + $0xb8] sm:$0xff]  }
  0x50   :  { %525 = vmatpush1.bf16.msra.mxu0 %v1047_v21  ;;  %568 = vmatpush1.bf16.msra.mxu1 %v1049_v24  ;;  %v1212_v21 = vld [vmem:[#allocation5 + $0x20] sm:$0xff]   ;;  %v1215_v24 = vld [vmem:[#allocation5 + $0xe8] sm:$0xff]  }
  0x51   :  { %526 = vmatprep.subr.bf16.mxu0 %v1056_v25  ;;  %569 = vmatprep.subr.bf16.mxu1 %v1058_v28  ;;  %v1216_v25 = vld [vmem:[#allocation5 + $0x28] sm:$0xff]   ;;  %v1219_v28 = vld [vmem:[#allocation5 + $0xf0] sm:$0xff]  }
  0x54   :  { %527 = vmatpush1.bf16.msra.mxu0 %v1055_v29  ;;  %570 = vmatpush1.bf16.msra.mxu1 %v1057_v32  ;;  %v1220_v29 = vld [vmem:[#allocation5 + $0x30] sm:$0xff]   ;;  %v1223_v32 = vld [vmem:[#allocation5 + $0xf8] sm:$0xff]  }
  0x55   :  { %528 = vmatprep.subr.bf16.mxu0 %v1064_v33  ;;  %571 = vmatprep.subr.bf16.mxu1 %v1066_v35  ;;  %v1224_v33 = vld [vmem:[#allocation5 + $0x38] sm:$0xff]  }
  0x58   :  { %529 = vmatpush1.bf16.msra.mxu0 %v1063_v37  ;;  %572 = vmatpush1.bf16.msra.mxu1 %v1065_v38 }
  0x59   :  { %530 = vmatprep.subr.bf16.mxu0 %v1072_v39  ;;  %573 = vmatprep.subr.bf16.mxu1 %v1074_v0 }
  0x5c   :  { %531 = vmatpush1.bf16.msra.mxu0 %v1071_v44  ;;  %574 = vmatpush1.bf16.msra.mxu1 %v1073_v45 }
  0x5d   :  { %532 = vmatprep.subr.bf16.mxu0 %v1080_v46  ;;  %575 = vmatprep.subr.bf16.mxu1 %v1082_v47 }
  0x60   :  { %533 = vmatpush1.bf16.msra.mxu0 %v1079_v52  ;;  %576 = vmatpush1.bf16.msra.mxu1 %v1081_v53 }
  0x61   :  { %534 = vmatprep.subr.bf16.mxu0 %v1088_v54  ;;  %577 = vmatprep.subr.bf16.mxu1 %v1090_v55 }
  0x64   :  { %535 = vmatpush1.bf16.msra.mxu0 %v1087_v60  ;;  %578 = vmatpush1.bf16.msra.mxu1 %v1089_v61 }
  0x65   :  { %536 = vmatprep.subr.bf16.mxu0 %v1096_v62  ;;  %579 = vmatprep.subr.bf16.mxu1 %v1098_v63 }
  0x68   :  { %537 = vmatpush1.bf16.msra.mxu0 %v1095_v1  ;;  %580 = vmatpush1.bf16.msra.mxu1 %v1097_v2 }
  0x69   :  { %1139 = vmatprep.subr.bf16.mxu0 %v1194_v3  ;;  %1161 = vmatprep.subr.bf16.mxu1 %v1195_v4 }
  0x6b   :  { %555 = vmatmul.mubr.bf16.vlgmr.msra.gmra.mrb[4].mxu0 %v1389_v8  ;;  %598 = vmatmul.mubr.bf16.vlgmr.msra.gmra.mrb[4].mxu1 %v1389_v8  ;;  %v1205_v8 = vld [vmem:[#allocation5 + $0x90] sm:$0xff]  }
  0x6c   :  { %1140 = vmatpush3.bf16.msra.mxu0 %v1196_v5  ;;  %1162 = vmatpush3.bf16.msra.mxu1 %v1197_v6 }
  0x6d   :  { %1141 = vmatprep.subr.bf16.mxu0 %v1198_v7  ;;  %1163 = vmatprep.subr.bf16.mxu1 %v1199_v9 }
  0x70   :  { %1142 = vmatpush3.bf16.msra.mxu0 %v1200_v10  ;;  %1164 = vmatpush3.bf16.msra.mxu1 %v1201_v11 }
  0x71   :  { %1143 = vmatprep.subr.bf16.mxu0 %v1202_v12  ;;  %1165 = vmatprep.subr.bf16.mxu1 %v1203_v13 }
  0x74   :  { %1144 = vmatpush3.bf16.msra.mxu0 %v1204_v14  ;;  %1166 = vmatpush3.bf16.msra.mxu1 %v1205_v8 }
  0x75   :  { %1145 = vmatprep.subr.bf16.mxu0 %v1206_v15  ;;  %1167 = vmatprep.subr.bf16.mxu1 %v1207_v16 }
  0x78   :  { %1146 = vmatpush3.bf16.msra.mxu0 %v1208_v17  ;;  %1168 = vmatpush3.bf16.msra.mxu1 %v1209_v18 }
  0x79   :  { %1147 = vmatprep.subr.bf16.mxu0 %v1210_v19  ;;  %1169 = vmatprep.subr.bf16.mxu1 %v1211_v20 }
  0x7c   :  { %1148 = vmatpush3.bf16.msra.mxu0 %v1212_v21  ;;  %1170 = vmatpush3.bf16.msra.mxu1 %v1213_v22 }
  0x7d   :  { %1149 = vmatprep.subr.bf16.mxu0 %v1214_v23  ;;  %1171 = vmatprep.subr.bf16.mxu1 %v1215_v24 }
  0x80   :  { %1150 = vmatpush3.bf16.msra.mxu0 %v1216_v25  ;;  %1172 = vmatpush3.bf16.msra.mxu1 %v1217_v26 }
  0x81   :  { %1151 = vmatprep.subr.bf16.mxu0 %v1218_v27  ;;  %1173 = vmatprep.subr.bf16.mxu1 %v1219_v28 }
  0x84   :  { %1152 = vmatpush3.bf16.msra.mxu0 %v1220_v29  ;;  %1174 = vmatpush3.bf16.msra.mxu1 %v1221_v30 }
  0x85   :  { %1153 = vmatprep.subr.bf16.mxu0 %v1222_v31  ;;  %1175 = vmatprep.subr.bf16.mxu1 %v1223_v32 }
  0x88   :  { %1154 = vmatpush3.bf16.msra.mxu0 %v1224_v33  ;;  %1176 = vmatpush3.bf16.msra.mxu1 %v1225_v34 }
 0x11e   :  { %v470_v35 = vpop.f32.mrb[0].mxu0  ;;  %v513_v37 = vpop.f32.mrb[0].mxu1 }
 0x11f   :  { %v1099_v36 = vmul.f32 -1.442695, %v470_v35  ;;  %v472_v38 = vpop.f32.mrb[1].mxu0  ;;  %v1101_v39 = vmul.f32 -1.442695, %v513_v37  ;;  %v515_v40 = vpop.f32.mrb[1].mxu1 }
 0x120   :  { %v1100_v0 = vmul.f32 -1.442695, %v472_v38  ;;  %v474_v41 = vpop.f32.mrb[2].mxu0  ;;  %v1102_v42 = vmul.f32 -1.442695, %v515_v40  ;;  %v517_v44 = vpop.f32.mrb[2].mxu1 }
 0x121   :  { %1226 = vpow2.f32 %v1099_v36  ;;  %v1103_v43 = vmul.f32 -1.442695, %v474_v41  ;;  %v476_v45 = vpop.f32.mrb[3].mxu0  ;;  %v1105_v46 = vmul.f32 -1.442695, %v517_v44  ;;  %v519_v47 = vpop.f32.mrb[3].mxu1 }
 0x122   :  { %1228 = vpow2.f32 %v1101_v39  ;;  %v1104_v48 = vmul.f32 -1.442695, %v476_v45  ;;  %v1106_v49 = vmul.f32 -1.442695, %v519_v47 }
 0x123   :  { %1230 = vpow2.f32 %v1100_v0 }
 0x124   :  { %1232 = vpow2.f32 %v1102_v42 }
 0x125   :  { %1234 = vpow2.f32 %v1103_v43 }
 0x126   :  { %1236 = vpow2.f32 %v1105_v46 }
 0x127   :  { %1238 = vpow2.f32 %v1104_v48 }
 0x128   :  { %1240 = vpow2.f32 %v1106_v49 }
 0x12b   :  { %v1227_v50 = vpop.eup %1226 }
 0x12c   :  { %v1229_v51 = vpop.eup %1228  ;;  %v632_v52 = vadd.f32 1.0, %v1227_v50 }
 0x12d   :  { %v1231_v53 = vpop.eup %1230  ;;  %v634_v54 = vadd.f32 1.0, %v1229_v51 }
 0x12e   :  { %v1233_v55 = vpop.eup %1232  ;;  %1242 = vrcp.f32 %v632_v52  ;;  %v633_v56 = vadd.f32 1.0, %v1231_v53 }
 0x12f   :  { %v1235_v57 = vpop.eup %1234  ;;  %1244 = vrcp.f32 %v634_v54  ;;  %v635_v58 = vadd.f32 1.0, %v1233_v55 }
 0x130   :  { %v1237_v59 = vpop.eup %1236  ;;  %1246 = vrcp.f32 %v633_v56  ;;  %v636_v60 = vadd.f32 1.0, %v1235_v57 }
 0x131   :  { %v1239_v61 = vpop.eup %1238  ;;  %1248 = vrcp.f32 %v635_v58  ;;  %v638_v62 = vadd.f32 1.0, %v1237_v59 }
 0x132   :  { %v1241_v63 = vpop.eup %1240  ;;  %1250 = vrcp.f32 %v636_v60  ;;  %v637_v1 = vadd.f32 1.0, %v1239_v61 }
 0x133   :  { %1252 = vrcp.f32 %v638_v62  ;;  %v639_v2 = vadd.f32 1.0, %v1241_v63 }
 0x134   :  { %1254 = vrcp.f32 %v637_v1 }
 0x135   :  { %1256 = vrcp.f32 %v639_v2 }
 0x138   :  { %v1243_v3 = vpop.eup %1242 }
 0x139   :  { %v1245_v4 = vpop.eup %1244  ;;  %v656_v10 = vmul.f32 %v1243_v3, %v470_v35 }
 0x13a   :  { %v1247_v5 = vpop.eup %1246  ;;  %v658_v12 = vmul.f32 %v1245_v4, %v513_v37 }
 0x13b   :  { %v1249_v6 = vpop.eup %1248  ;;  %v657_v13 = vmul.f32 %v1247_v5, %v472_v38 }
 0x13c   :  { %v1251_v7 = vpop.eup %1250  ;;  %v659_v15 = vmul.f32 %v1249_v6, %v515_v40 }
 0x13d   :  { %v1253_v9 = vpop.eup %1252  ;;  %v660_v16 = vmul.f32 %v1251_v7, %v474_v41 }
 0x13e   :  { %v1255_v11 = vpop.eup %1254  ;;  %v556_v14 = vpop.f32.mrb[4].mxu0  ;;  %v662_v20 = vmul.f32 %v1253_v9, %v517_v44 }
 0x13f   :  { %v1257_v8 = vpop.eup %1256  ;;  %v664_v17 = vmul.f32 %v656_v10, %v556_v14  ;;  %v599_v18 = vpop.f32.mrb[4].mxu1  ;;  %v661_v21 = vmul.f32 %v1255_v11, %v476_v45 }
 0x140   :  { %v558_v19 = vpop.f32.mrb[5].mxu0  ;;  %v666_v22 = vmul.f32 %v658_v12, %v599_v18  ;;  %v601_v24 = vpop.f32.mrb[5].mxu1  ;;  %v663_v26 = vmul.f32 %v1257_v8, %v519_v47 }
 0x141   :  { %v665_v23 = vmul.f32 %v657_v13, %v558_v19  ;;  %v560_v25 = vpop.f32.mrb[6].mxu0  ;;  %v667_v27 = vmul.f32 %v659_v15, %v601_v24  ;;  %v603_v29 = vpop.f32.mrb[6].mxu1 }
 0x142   :  { %v668_v28 = vmul.f32 %v660_v16, %v560_v25  ;;  %v562_v30 = vpop.f32.mrb[7].mxu0  ;;  %v670_v31 = vmul.f32 %v662_v20, %v603_v29  ;;  %v605_v33 = vpop.f32.mrb[7].mxu1 }
 0x143   :  { %v669_v32 = vmul.f32 %v661_v21, %v562_v30  ;;  %v671_v35 = vmul.f32 %v663_v26, %v605_v33 }
 0x144   :  { %v672_v34 = vpack.c.bf16 %v668_v28, %v664_v17  ;;  %v674_v36 = vpack.c.bf16 %v670_v31, %v666_v22 }
 0x145   :  { %v673_v37 = vpack.c.bf16 %v669_v32, %v665_v23  ;;  %v675_v38 = vpack.c.bf16 %v671_v35, %v667_v27 }
 0x147   :  { %964 = vmatprep.mubr.bf16.mxu0 %v673_v37  ;;  %1005 = vmatprep.mubr.bf16.mxu1 %v675_v38 }
 0x148   :  { %965 = vmatmul.mubr.bf16.vlgmr.msra.gmra.mrb[8].mxu0 %v672_v34  ;;  %1006 = vmatmul.mubr.bf16.vlgmr.msra.gmra.mrb[8].mxu1 %v674_v36 }
 0x21b   :  { %v1155_v39 = vpop.f32.mrb[8].mxu0  ;;  %v1177_v0 = vpop.f32.mrb[8].mxu1 }
 0x21c   :  { %v1156_v40 = vpop.f32.mrb[9].mxu0  ;;  %v1178_v42 = vpop.f32.mrb[9].mxu1 }
 0x21d   :  { %v1157_v41 = vadd.f32 %v1156_v40, %v1155_v39  ;;  %v1158_v43 = vpop.f32.mrb[10].mxu0  ;;  %v1179_v44 = vadd.f32 %v1178_v42, %v1177_v0  ;;  %v1180_v45 = vpop.f32.mrb[10].mxu1 }
 0x21e   :  { %v1159_v46 = vpop.f32.mrb[11].mxu0  ;;  %v1181_v48 = vpop.f32.mrb[11].mxu1 }
 0x21f   :  { %v1160_v47 = vadd.f32 %v1159_v46, %v1158_v43  ;;  %v1008_v49 = vadd.f32 %v1179_v44, %v1157_v41  ;;  %v1182_v50 = vadd.f32 %v1181_v48, %v1180_v45 }
 0x221   :  { %1014 = vst [vmem:[#allocation7] sm:$0xff] %v1008_v49  ;;  %v1011_v51 = vadd.f32 %v1182_v50, %v1160_v47 }
 0x223   :  { %1015 = vst [vmem:[#allocation7 + $0x8] sm:$0xff] %v1011_v51 }
 0x224   :  { %1313 = shalt.err (!%p1310_p6)
}
 0x225   :  { %s1314_s17 = scalar_lea.hbm %s1412_s3, 256 }
 0x226   :  { %p1315_p7 = scmp.ne.s32.totalorder %s1412_s3, %s1314_s17  ;;  %p1318_p8 = scmp.lt.u32.totalorder %s1314_s17, %s1412_s3 }
 0x228   :  { %p1320_p9 = pnand %p1318_p8, %p1315_p7 }
 0x22a   :  { %1323 = shalt.err (!%p1320_p9)
}
 0x22b   :  { %s1338_s22 = smov 128   ;;  %s1339_s23 = smov 8  }
 0x22c   :  { %1027 = dma.vmem_to_hbm [thread:$0]  %s1022_s13, 256, %s1412_s3, [#allocation4], %s1338_s22, %s1338_s22, %s1339_s23  }
 0x22d   :  { %1328 = dma.done.wait [#allocation4], 256  }
 0x22e   :  { %1329 = vsyncadd [#allocation4], 4294967040 }
 0x22f   :  { %1031 = vsyncpa [#allocation3], 1 }
 0x230   :  { %1032 = vsyncpa [#allocation6], 1 }
 0x231   :  { %1033 = vsyncpa [#allocation4], 1 }

</bundles_post_ra>
